<compile_context>
chip_gen: v7x
topology: tpu7x:2x2x1
jax: 0.10.0
libtpu: 0.0.40
codegen_flags: <defaults>
</compile_context>

<pallas_src>
import warnings

import numpy as np
import jax
import jax.numpy as jnp
from jax import lax
from jax.experimental import pallas as pl
from jax.experimental.pallas import tpu as pltpu

# Donation may be unusable on the padded / bitcast fallback paths; that only
# produces a UserWarning (XLA falls back to a copy), which we silence.
warnings.filterwarnings("ignore", message="Some donated buffers were not usable")

_LANE = 128
# ~8 MiB tiles: per the review, at v7x HBM bandwidth a 2 MiB tile loses
# 25-30% to per-grid-step overhead; 8 MiB drops that below 10%.  VMEM cost is
# 2 specs x 2 buffers x 8 MiB = 32 MiB, which fits v7x's 64 MiB physical VMEM.
_TARGET_TILE_BYTES = 8 * 1024 * 1024


def _identity_copy_kernel(x_ref, o_ref):
    # Pure streaming passthrough: one lane-dense VMEM tile at a time.
    o_ref[...] = x_ref[...]


def _choose_lane_width(total):
    """Largest lane-dense width (multiple of 128) that divides `total`."""
    for lane_w in (4096, 2048, 1024, 512, 256, _LANE):
        if total % lane_w == 0:
            return lane_w
    return None


def _choose_tile_rows(rows, lane_w, itemsize):
    """Pick tile_r near the target tile size, preferring a divisor of rows."""
    target_rows = max(8, _TARGET_TILE_BYTES // (lane_w * itemsize))
    if rows <= target_rows:
        return rows  # single resident block == full array (exempt from 8x128 rule)
    t = max(8, (target_rows // 8) * 8)
    # Prefer a divisor of rows (multiple of 8) so the last grid step is not a
    # partial block (partial blocks lower to masked vst / partial DMA).
    for cand in range(t, 7, -8):
        if rows % cand == 0:
            return cand
    return t  # partial last block: still correct, just slightly slower


def _tiled_copy_2d(x2d, tile_r):
    rows, lane_w = x2d.shape
    itemsize = jnp.dtype(x2d.dtype).itemsize
    tile_bytes = tile_r * lane_w * itemsize
    nbytes = x2d.size * itemsize
    # 2 specs (input + aliased output) x default double-buffering x tile size,
    # plus headroom for Mosaic internal scratch.  ~40 MiB for 8 MiB tiles,
    # comfortably under v7x's 64 MiB physical VMEM.
    vmem_limit = int(4 * tile_bytes + 8 * 1024 * 1024)
    return pl.pallas_call(
        _identity_copy_kernel,
        out_shape=jax.ShapeDtypeStruct(x2d.shape, x2d.dtype),
        grid=(pl.cdiv(rows, tile_r),),
        in_specs=[pl.BlockSpec((tile_r, lane_w), lambda i: (i, 0))],
        out_specs=pl.BlockSpec((tile_r, lane_w), lambda i: (i, 0)),
        # Output aliases the input: with a donated jit argument no separate
        # HBM output allocation (and no defensive copy) is made.
        input_output_aliases={0: 0},
        cost_estimate=pl.CostEstimate(
            flops=0, transcendentals=0, bytes_accessed=2 * nbytes),
        compiler_params=pltpu.CompilerParams(
            # TODO(synk): verify megacore sharding on v7x; if plain "parallel"
            # does not split the row axis across the 2 TensorCores, switch to
            # pltpu.CORE_PARALLEL.  Neutral on single-TC v5e/v6e.
            dimension_semantics=("parallel",),
            vmem_limit_bytes=vmem_limit,
        ),
    )(x2d)


def _materialized_identity(x):
    """Lane-dense, tiled, aliased Pallas streaming copy of x."""
    orig_shape, orig_dtype = x.shape, x.dtype
    flat = x.reshape(-1)
    itemsize = jnp.dtype(orig_dtype).itemsize

    # Sub-32-bit dtypes: bitcast to 32-bit words so sublane-packing minimums
    # (16 rows for bf16, 32 for int8) never apply and vld/vst stay dense.
    packed = False
    if itemsize < 4 and (flat.size * itemsize) % 4 == 0:
        k = 4 // itemsize
        flat = lax.bitcast_convert_type(flat.reshape(-1, k), jnp.uint32)
        packed = True
        itemsize = 4

    total = flat.size
    lane_w = _choose_lane_width(total)
    padded = False
    if lane_w is None:
        # Pad to a multiple of 8*512 and reuse the tiled lane-dense path
        # (replaces the old unbounded single (1, N) whole-array block).
        lane_w = 512
        padded_total = ((total + 8 * lane_w - 1) // (8 * lane_w)) * (8 * lane_w)
        flat = jnp.concatenate(
            [flat, jnp.zeros((padded_total - total,), flat.dtype)])
        padded = True

    rows = flat.size // lane_w
    tile_r = _choose_tile_rows(rows, lane_w, itemsize)
    out = _tiled_copy_2d(flat.reshape(rows, lane_w), tile_r).reshape(-1)

    if padded:
        out = out[:total]
    if packed:
        out = lax.bitcast_convert_type(out, orig_dtype).reshape(-1)
    return out.reshape(orig_shape)


# Donated jit: makes input_output_aliases={0:0} a true in-place alias (no
# hidden defensive HBM copy of x before the pallas_call).
_materialized_identity_jit = jax.jit(_materialized_identity, donate_argnums=0)


def basemodel_forward(x, materialize=False):
    """Forward pass for the (abstract) BaseModel.

    BaseModel declares no parameters/buffers and forward() is abstract, so
    the only defined behaviour is the identity.  The default path returns x
    unchanged -- zero bytes of HBM traffic (highest-value optimization).
    Set materialize=True to force a physically materialized Pallas copy
    (lane-dense, ~8 MiB tiles, aliased + donated, double-buffered).
    """
    if not materialize:
        return x
    return _materialized_identity_jit(x)


class BaseModelJAX:
    """JAX/Pallas analogue of the PyTorch BaseModel utility class."""

    def __init__(self):
        # Abstract base: no parameters, no buffers.
        self.params = {}
        self.buffers = {}

    def forward(self, x, materialize=False):
        return basemodel_forward(x, materialize=materialize)

    @property
    def device(self):
        leaves = jax.tree_util.tree_leaves(self.params)
        return leaves[0].devices() if leaves else None

    @property
    def param_counts(self):
        tot = sum(int(p.size) for p in jax.tree_util.tree_leaves(self.params))
        # All params are trainable by default (there are none here).
        return (tot, tot)

    @property
    def size(self):
        params_mem = sum(
            int(p.size) * jnp.dtype(p.dtype).itemsize
            for p in jax.tree_util.tree_leaves(self.params))
        bufs_mem = sum(
            int(b.size) * jnp.dtype(b.dtype).itemsize
            for b in jax.tree_util.tree_leaves(self.buffers))
        return params_mem + bufs_mem


if __name__ == "__main__":
    key = jax.random.PRNGKey(0)
    k1, k2, k3 = jax.random.split(key, 3)
    model = BaseModelJAX()

    # 1) Default forward: zero-copy identity (the highest-value path).
    x = jax.random.normal(k1, (2, 4, 16, 16), dtype=jnp.float32)
    y = model.forward(x)
    assert y is x

    # 2) Materialized Pallas copy: lane-dense tiled aliased/donated path.
    x2 = jax.random.normal(k2, (2, 4, 16, 16), dtype=jnp.float32)
    x2_host = np.asarray(jax.device_get(x2))  # host copy before donation
    y2 = jax.block_until_ready(model.forward(x2, materialize=True))
    assert y2.shape == x2_host.shape and y2.dtype == x2_host.dtype
    assert np.array_equal(np.asarray(jax.device_get(y2)), x2_host)

    # 3) Padded fallback path (total not divisible by 128).
    x3 = jax.random.normal(k3, (2, 3, 7, 5), dtype=jnp.float32)
    x3_host = np.asarray(jax.device_get(x3))
    y3 = jax.block_until_ready(model.forward(x3, materialize=True))
    assert np.array_equal(np.asarray(jax.device_get(y3)), x3_host)

    # 4) Sub-32-bit dtype path (bitcast to 32-bit words before tiling).
    x4 = jax.random.normal(k1, (2, 4, 16, 16), dtype=jnp.bfloat16)
    x4_host = np.asarray(jax.device_get(x4))
    y4 = jax.block_until_ready(model.forward(x4, materialize=True))
    assert np.array_equal(
        np.asarray(jax.device_get(y4)).astype(np.float32),
        x4_host.astype(np.float32))

    # BaseModel bookkeeping semantics: no params, no buffers.
    assert model.param_counts == (0, 0)
    assert model.size == 0

    print("KERNEL_OK")
</pallas_src>

<mosaic_0001>
module attributes {stable_mosaic.version = 11 : i64} {
  func.func @_identity_copy_kernel(%arg0: i32, %arg1: memref<1x2048xf32, #tpu.memory_space<vmem>>, %arg2: memref<1x2048xf32, #tpu.memory_space<vmem>>) attributes {dimension_semantics = [#tpu.dimension_semantics<parallel>], iteration_bounds = array<i64: 1>, scalar_prefetch = 0 : i64, scratch_operands = 0 : i64, tpu.core_type = #tpu.core_type<tc>, window_params = [{transform_indices = @transform_0, window_bounds = array<i64: 1, 2048>}, {transform_indices = @transform_1, window_bounds = array<i64: 1, 2048>}]} {
    %c0 = arith.constant 0 : index
    %c0_0 = arith.constant 0 : index
    %0 = vector.load %arg1[%c0, %c0_0] : memref<1x2048xf32, #tpu.memory_space<vmem>>, vector<1x2048xf32>
    %c0_1 = arith.constant 0 : index
    %c0_2 = arith.constant 0 : index
    %1 = vector.load %arg2[%c0_1, %c0_2] : memref<1x2048xf32, #tpu.memory_space<vmem>>, vector<1x2048xf32>
    tpu.vector_store %arg2[%c0_1, %c0_2], %0 {strides = array<i32>} : memref<1x2048xf32, #tpu.memory_space<vmem>>, vector<1x2048xf32>,
    return
  }
  func.func @transform_0(%arg0: i32) -> (i32, i32) {
    %c0_i32 = arith.constant 0 : i32
    %c0_i32_0 = arith.constant 0 : i32
    return %arg0, %c0_i32 : i32, i32
  }
  func.func @transform_1(%arg0: i32) -> (i32, i32) {
    %c0_i32 = arith.constant 0 : i32
    %c0_i32_0 = arith.constant 0 : i32
    return %arg0, %c0_i32 : i32, i32
  }
}

</mosaic_0001>

<bundles_post_ra>
// kernel: _materialized_identity.1
= control target key start
LH: loop header
LB: loop body
LE: loop exit
PB: predicated region body
PF: predicated region fallthrough
CT: control target
= control target key end

     0   :  { %s38_s0 = inlined_call_operand.vmem [shape: f32[1,2048], index: 0, kind: input, shape index: {}, may-alias: {0,1}]   ;;  %s39_s1 = inlined_call_operand.vmem [shape: f32[1,2048], index: 1, kind: output, shape index: {}, may-alias: {0,1}]  }
   0x1   :  { %v8_v0 = vld [vmem:[%s38_s0] sm:$0xff]  ;;  %v9_v1 = vld [vmem:[%s38_s0 + $0x8] sm:$0xff] }
   0x2   :  { %10 = vst [vmem:[%s39_s1] sm:$0xff] %v8_v0  ;;  %11 = vst [vmem:[%s39_s1 + $0x8] sm:$0xff] %v9_v1 }

</bundles_post_ra>
